<compile_context>
chip_gen: v6e
topology: v6e:2x2x1
jax: 0.10.0
libtpu: 0.0.40
codegen_flags: <defaults>
</compile_context>

<pallas_src>
import functools

import jax
import jax.numpy as jnp
from jax import lax
from jax.experimental import pallas as pl
from jax.experimental.pallas import tpu as pltpu

_EPS = 1e-8  # torch.nn.functional.cosine_similarity default eps


def _mrl_fused_kernel(w_ref, e1_ref, e2_ref, loss_ref, *, inv_temp: float):
    """One matryoshka level per grid step.

    w_ref          : (L,) f32 SMEM ref with per-level weights
    e1_ref, e2_ref : (B, D_max) VMEM refs (level dim squeezed; zero-padded cols)
    loss_ref       : (1, 1) f32 VMEM ref, resident across the level grid axis
    """
    level = pl.program_id(0)

    @pl.when(level == 0)
    def _init():
        loss_ref[...] = jnp.zeros_like(loss_ref)

    e1 = e1_ref[...]                                  # (B, D) input dtype
    e2 = e2_ref[...]                                  # (B, D)

    # Row L2 norms in f32 (zero-padded feature columns contribute nothing).
    e1f = e1.astype(jnp.float32)
    e2f = e2.astype(jnp.float32)
    n1 = jnp.sqrt(jnp.sum(e1f * e1f, axis=-1, keepdims=True))   # (B, 1)
    n2 = jnp.sqrt(jnp.sum(e2f * e2f, axis=-1, keepdims=True))   # (B, 1)

    # Pairwise dots on the MXU: contract both operands on the last (lane) dim
    # directly — no explicit transpose / VMEM relayout of e2.
    dots = lax.dot_general(
        e1, e2,
        dimension_numbers=(((1,), (1,)), ((), ())),
        preferred_element_type=jnp.float32)                     # (B, B)

    # cosine similarity with the torch eps clamp (max(||a||*||b||, eps)),
    # temperature applied as a single compile-time-constant multiply.
    inv_denom = pl.reciprocal(jnp.maximum(n1 * n2.T, _EPS))     # (B, B)
    sim = dots * inv_denom * inv_temp                           # (B, B)

    # Cross entropy with labels = arange(B), reduction='mean'.
    # Keep everything (B, 1) keepdims — no 1-D sublane/lane relayouts.
    m = jnp.max(sim, axis=-1, keepdims=True)                    # (B, 1)
    lse = m + jnp.log(jnp.sum(jnp.exp(sim - m), axis=-1, keepdims=True))

    # Diagonal logits computed row-wise — no (B, B) iota masks needed.
    diag_dots = jnp.sum(e1f * e2f, axis=-1, keepdims=True)      # (B, 1)
    diag_sim = (diag_dots
                * pl.reciprocal(jnp.maximum(n1 * n2, _EPS))
                * inv_temp)                                     # (B, 1)

    level_loss = jnp.mean(lse - diag_sim)                       # scalar f32

    # Weighted accumulation directly into the resident scalar output.
    w = w_ref[level]                                            # SMEM scalar read
    loss_ref[...] = loss_ref[...] + w * level_loss


def _fused_weighted_loss(weights: jax.Array, x1: jax.Array, x2: jax.Array,
                         temperature: float) -> jax.Array:
    """weights: (L,) f32; x1, x2: (L, B, D_max) zero-padded stacks.

    Returns the scalar weighted sum of per-level losses.
    """
    num_levels, batch, d_max = x1.shape
    kernel = functools.partial(_mrl_fused_kernel,
                               inv_temp=float(1.0 / temperature))
    out = pl.pallas_call(
        kernel,
        out_shape=jax.ShapeDtypeStruct((1, 1), jnp.float32),
        grid_spec=pltpu.PrefetchScalarGridSpec(
            num_scalar_prefetch=0,
            grid=(num_levels,),
            in_specs=[
                pl.BlockSpec(memory_space=pltpu.MemorySpace.SMEM),
                pl.BlockSpec((None, batch, d_max), lambda l: (l, 0, 0)),
                pl.BlockSpec((None, batch, d_max), lambda l: (l, 0, 0)),
            ],
            # Output block is resident across the level axis; each step
            # accumulates into it, single HBM writeback at the end.
            out_specs=pl.BlockSpec((1, 1), lambda l: (0, 0)),
        ),
        compiler_params=pltpu.CompilerParams(
            dimension_semantics=("arbitrary",)),
    )(weights, x1, x2)
    return out[0, 0]


def matryoshka_contrastive_loss(emb1, emb2, *, relative_importance=None,
                                temperature=1.0):
    """JAX/Pallas equivalent of MatryoshkaContrastiveLoss.forward.

    emb1, emb2: tuples/lists of (B, D_k) arrays (one per matryoshka dim).
    Returns a scalar: sum_k w_k * CE(cosine_sim(emb1_k, emb2_k)/T, arange(B)).
    """
    emb1 = tuple(emb1)
    emb2 = tuple(emb2)
    num_levels = len(emb1)
    d_max = max(int(e.shape[-1]) for e in emb1)
    dtype = jnp.result_type(*[e.dtype for e in emb1], *[e.dtype for e in emb2])

    def stack_pad(embs):
        padded = [
            jnp.pad(e.astype(dtype), ((0, 0), (0, d_max - int(e.shape[-1]))))
            for e in embs
        ]
        return jnp.stack(padded, axis=0)          # (L, B, D_max)

    if relative_importance is None:
        weights = jnp.ones((num_levels,), jnp.float32)
    else:
        weights = jnp.asarray(relative_importance, dtype=jnp.float32)

    return _fused_weighted_loss(weights, stack_pad(emb1), stack_pad(emb2),
                                temperature)


def _reference_loss(emb1, emb2, relative_importance, temperature):
    """Pure-JAX reference of the PyTorch module (for validation only)."""
    per_level = []
    for e1, e2 in zip(emb1, emb2):
        e1 = e1.astype(jnp.float32)
        e2 = e2.astype(jnp.float32)
        n1 = jnp.linalg.norm(e1, axis=-1, keepdims=True)
        n2 = jnp.linalg.norm(e2, axis=-1, keepdims=True)
        sim = (e1 @ e2.T) / jnp.maximum(n1 * n2.T, _EPS) / temperature
        lse = jax.nn.logsumexp(sim, axis=-1)
        diag = jnp.diagonal(sim)
        per_level.append(jnp.mean(lse - diag))
    per_level = jnp.stack(per_level)
    if relative_importance is None:
        w = jnp.ones_like(per_level)
    else:
        w = jnp.asarray(relative_importance, dtype=per_level.dtype)
    return jnp.sum(w * per_level)


if __name__ == "__main__":
    key = jax.random.PRNGKey(0)
    B = 8
    matryoshka_dims = (8, 16, 32)          # nested representation sizes
    relative_importance = [1.0, 0.5, 0.25]
    temperature = 0.07

    keys = jax.random.split(key, 2 * len(matryoshka_dims))
    emb1 = tuple(
        jax.random.normal(keys[2 * i], (B, d), dtype=jnp.float32)
        for i, d in enumerate(matryoshka_dims)
    )
    emb2 = tuple(
        jax.random.normal(keys[2 * i + 1], (B, d), dtype=jnp.float32)
        for i, d in enumerate(matryoshka_dims)
    )

    loss = matryoshka_contrastive_loss(
        emb1, emb2,
        relative_importance=relative_importance,
        temperature=temperature,
    )
    jax.block_until_ready(loss)

    ref = _reference_loss(emb1, emb2, relative_importance, temperature)
    assert jnp.allclose(loss, ref, rtol=1e-3, atol=1e-3), (loss, ref)

    # Also exercise the relative_importance=None path (weights of ones).
    loss_none = matryoshka_contrastive_loss(emb1, emb2, temperature=temperature)
    ref_none = _reference_loss(emb1, emb2, None, temperature)
    jax.block_until_ready(loss_none)
    assert jnp.allclose(loss_none, ref_none, rtol=1e-3, atol=1e-3), (
        loss_none, ref_none)

    print("KERNEL_OK")
</pallas_src>

<mosaic_0001>
module attributes {stable_mosaic.version = 11 : i64} {
  func.func @_mrl_fused_kernel(%arg0: i32, %arg1: memref<3xf32, #tpu.memory_space<smem>>, %arg2: memref<1x8x32xf32, #tpu.memory_space<vmem>>, %arg3: memref<1x8x32xf32, #tpu.memory_space<vmem>>, %arg4: memref<1x1xf32, #tpu.memory_space<vmem>>) attributes {dimension_semantics = [#tpu.dimension_semantics<arbitrary>], iteration_bounds = array<i64: 3>, scalar_prefetch = 0 : i64, scratch_operands = 0 : i64, tpu.core_type = #tpu.core_type<tc>, window_params = [{transform_indices = @transform_0, window_bounds = array<i64: 3>}, {transform_indices = @transform_1, window_bounds = array<i64: 1, 8, 32>}, {transform_indices = @transform_2, window_bounds = array<i64: 1, 8, 32>}, {pipeline_mode = #tpu.pipeline_mode<synchronous>, transform_indices = @transform_3, window_bounds = array<i64: 1, 1>}]} {
    %c0_i32 = arith.constant 0 : i32
    %0 = arith.cmpi eq, %arg0, %c0_i32 : i32
    %1 = arith.extui %0 : i1 to i32
    %c0_i32_0 = arith.constant 0 : i32
    %2 = arith.cmpi ne, %1, %c0_i32_0 : i32
    scf.if %2 {
      %cst_21 = arith.constant 0.000000e+00 : f32
      %58 = vector.broadcast %cst_21 : f32 to vector<1x1xf32>
      %c0_22 = arith.constant 0 : index
      %c0_23 = arith.constant 0 : index
      %59 = vector.load %arg4[%c0_22, %c0_23] : memref<1x1xf32, #tpu.memory_space<vmem>>, vector<1x1xf32>
      tpu.vector_store %arg4[%c0_22, %c0_23], %58 {strides = array<i32>} : memref<1x1xf32, #tpu.memory_space<vmem>>, vector<1x1xf32>,
    } else {
    }
    %c0 = arith.constant 0 : index
    %c0_1 = arith.constant 0 : index
    %c0_2 = arith.constant 0 : index
    %3 = vector.load %arg2[%c0, %c0_1, %c0_2] : memref<1x8x32xf32, #tpu.memory_space<vmem>>, vector<1x8x32xf32>
    %4 = vector.shape_cast %3 : vector<1x8x32xf32> to vector<8x32xf32>
    %c0_3 = arith.constant 0 : index
    %c0_4 = arith.constant 0 : index
    %c0_5 = arith.constant 0 : index
    %5 = vector.load %arg3[%c0_3, %c0_4, %c0_5] : memref<1x8x32xf32, #tpu.memory_space<vmem>>, vector<1x8x32xf32>
    %6 = vector.shape_cast %5 : vector<1x8x32xf32> to vector<8x32xf32>
    %7 = arith.mulf %4, %4 : vector<8x32xf32>
    %cst = arith.constant dense<0.000000e+00> : vector<8xf32>
    %8 = vector.multi_reduction <add>, %7, %cst [1] : vector<8x32xf32> to vector<8xf32>
    %9 = vector.shape_cast %8 : vector<8xf32> to vector<8x1xf32>
    %10 = math.sqrt %9 : vector<8x1xf32>
    %11 = arith.mulf %6, %6 : vector<8x32xf32>
    %cst_6 = arith.constant dense<0.000000e+00> : vector<8xf32>
    %12 = vector.multi_reduction <add>, %11, %cst_6 [1] : vector<8x32xf32> to vector<8xf32>
    %13 = vector.shape_cast %12 : vector<8xf32> to vector<8x1xf32>
    %14 = math.sqrt %13 : vector<8x1xf32>
    %cst_7 = arith.constant dense<0.000000e+00> : vector<8x8xf32>
    %15 = tpu.matmul %4, %6, %cst_7 {dimension_numbers = #tpu.dot_dimension_numbers<[1], [1], [0], [0], [0, 0, 1, 0], [], []>} : vector<8x32xf32>, vector<8x32xf32>, vector<8x8xf32> -> vector<8x8xf32>
    %16 = tpu.transpose %14, [1, 0] : vector<8x1xf32> -> vector<1x8xf32>
    %17 = vector.broadcast %10 : vector<8x1xf32> to vector<8x8xf32>
    %18 = vector.broadcast %16 : vector<1x8xf32> to vector<8x8xf32>
    %19 = arith.mulf %17, %18 : vector<8x8xf32>
    %cst_8 = arith.constant 9.99999993E-9 : f32
    %20 = vector.broadcast %cst_8 : f32 to vector<8x8xf32>
    %21 = arith.maximumf %19, %20 : vector<8x8xf32>
    %22 = tpu.reciprocal %21 : vector<8x8xf32> -> vector<8x8xf32>
    %23 = arith.mulf %15, %22 : vector<8x8xf32>
    %cst_9 = arith.constant 14.2857141 : f32
    %24 = vector.broadcast %cst_9 : f32 to vector<8x8xf32>
    %25 = arith.mulf %23, %24 : vector<8x8xf32>
    %cst_10 = arith.constant dense<0xFF800000> : vector<8xf32>
    %26 = vector.multi_reduction <maximumf>, %25, %cst_10 [1] : vector<8x8xf32> to vector<8xf32>
    %27 = vector.shape_cast %26 : vector<8xf32> to vector<8x1xf32>
    %28 = vector.broadcast %27 : vector<8x1xf32> to vector<8x8xf32>
    %29 = arith.subf %25, %28 : vector<8x8xf32>
    %30 = math.exp %29 : vector<8x8xf32>
    %cst_11 = arith.constant dense<0.000000e+00> : vector<8xf32>
    %31 = vector.multi_reduction <add>, %30, %cst_11 [1] : vector<8x8xf32> to vector<8xf32>
    %32 = vector.shape_cast %31 : vector<8xf32> to vector<8x1xf32>
    %33 = math.log %32 : vector<8x1xf32>
    %34 = arith.addf %27, %33 : vector<8x1xf32>
    %35 = arith.mulf %4, %6 : vector<8x32xf32>
    %cst_12 = arith.constant dense<0.000000e+00> : vector<8xf32>
    %36 = vector.multi_reduction <add>, %35, %cst_12 [1] : vector<8x32xf32> to vector<8xf32>
    %37 = vector.shape_cast %36 : vector<8xf32> to vector<8x1xf32>
    %38 = arith.mulf %10, %14 : vector<8x1xf32>
    %cst_13 = arith.constant 9.99999993E-9 : f32
    %39 = vector.broadcast %cst_13 : f32 to vector<8x1xf32>
    %40 = arith.maximumf %38, %39 : vector<8x1xf32>
    %41 = tpu.reciprocal %40 : vector<8x1xf32> -> vector<8x1xf32>
    %42 = arith.mulf %37, %41 : vector<8x1xf32>
    %cst_14 = arith.constant 14.2857141 : f32
    %43 = vector.broadcast %cst_14 : f32 to vector<8x1xf32>
    %44 = arith.mulf %42, %43 : vector<8x1xf32>
    %45 = arith.subf %34, %44 : vector<8x1xf32>
    %46 = vector.shape_cast %45 : vector<8x1xf32> to vector<1x8x1xf32>
    %cst_15 = arith.constant dense<0.000000e+00> : vector<1xf32>
    %47 = vector.multi_reduction <add>, %46, %cst_15 [1, 2] : vector<1x8x1xf32> to vector<1xf32>
    %48 = vector.shape_cast %47 : vector<1xf32> to vector<1x1x1xf32>
    %49 = vector.extract %48[0, 0, 0] : f32 from vector<1x1x1xf32>
    %cst_16 = arith.constant 8.000000e+00 : f32
    %50 = arith.divf %49, %cst_16 : f32
    %51 = arith.index_cast %arg0 : i32 to index
    %52 = memref.load %arg1[%51] : memref<3xf32, #tpu.memory_space<smem>>
    %c0_17 = arith.constant 0 : index
    %c0_18 = arith.constant 0 : index
    %53 = vector.load %arg4[%c0_17, %c0_18] : memref<1x1xf32, #tpu.memory_space<vmem>>, vector<1x1xf32>
    %54 = arith.mulf %52, %50 : f32
    %55 = vector.broadcast %54 : f32 to vector<1x1xf32>
    %56 = arith.addf %53, %55 : vector<1x1xf32>
    %c0_19 = arith.constant 0 : index
    %c0_20 = arith.constant 0 : index
    %57 = vector.load %arg4[%c0_19, %c0_20] : memref<1x1xf32, #tpu.memory_space<vmem>>, vector<1x1xf32>
    tpu.vector_store %arg4[%c0_19, %c0_20], %56 {strides = array<i32>} : memref<1x1xf32, #tpu.memory_space<vmem>>, vector<1x1xf32>,
    return
  }
  func.func @transform_0(%arg0: i32) -> i32 {
    %c0_i32 = arith.constant 0 : i32
    %c0_i32_0 = arith.constant 0 : i32
    return %c0_i32 : i32
  }
  func.func @transform_1(%arg0: i32) -> (i32, i32, i32) {
    %c0_i32 = arith.constant 0 : i32
    %c0_i32_0 = arith.constant 0 : i32
    %c0_i32_1 = arith.constant 0 : i32
    return %arg0, %c0_i32, %c0_i32_0 : i32, i32, i32
  }
  func.func @transform_2(%arg0: i32) -> (i32, i32, i32) {
    %c0_i32 = arith.constant 0 : i32
    %c0_i32_0 = arith.constant 0 : i32
    %c0_i32_1 = arith.constant 0 : i32
    return %arg0, %c0_i32, %c0_i32_0 : i32, i32, i32
  }
  func.func @transform_3(%arg0: i32) -> (i32, i32) {
    %c0_i32 = arith.constant 0 : i32
    %c0_i32_0 = arith.constant 0 : i32
    %c0_i32_1 = arith.constant 0 : i32
    return %c0_i32, %c0_i32_0 : i32, i32
  }
}

</mosaic_0001>

<bundles_post_ra>
// kernel: tpu_custom_call.1
= control target key start
LH: loop header
LB: loop body
LE: loop exit
PB: predicated region body
PF: predicated region fallthrough
CT: control target
= control target key end

     0   :  { %8 = vsyncpa [#allocation5], 0  ;;  %s956_s0 = inlined_call_operand.hbm [shape: f32[3], index: 0, kind: input, shape index: {}]   ;;  %s957_s1 = inlined_call_operand.hbm [shape: f32[3,8,32], index: 1, kind: input, shape index: {}]   ;;  %s958_s2 = inlined_call_operand.hbm [shape: f32[3,8,32], index: 2, kind: input, shape index: {}]   ;;  %s959_s3 = inlined_call_operand.hbm [shape: f32[1,1], index: 3, kind: output, shape index: {}]  }
   0x1   :  { %9 = vsyncpa [#allocation3], 0 }
   0x2   :  { %11 = vsyncpa [#allocation3 + $0x1], 0 }
   0x3   :  { %12 = vsyncpa [#allocation8], 0 }
   0x4   :  { %14 = vsyncpa [#allocation8 + $0x1], 0 }
   0x5   :  { %15 = vsyncpa [#allocation4], 0  ;;  %s778_s12 = smov 0   ;;  %s780_s13 = smov 0  }
   0x6   :  { %s782_s14 = smov 0   ;;  %s784_s15 = smov 0  }
   0x7 LB: > { %s797_s16 = sadd.s32 4294967295, %s749_s15   ;;  %s800_s17 = sadd.s32 1, %s749_s15   ;;  %s749_s15 = sphi %s784_s15, %s974_s15   ;;  %s745_s14 = sphi %s782_s14, %s973_s14   ;;  %s741_s13 = sphi %s780_s13, %s972_s13   ;;  %s737_s12 = sphi %s778_s12, %s971_s12  }
   0x8   : > { %s46_s18 = ssub.s32 %s749_s15, %s800_s17  ;;  %s49_s19 = sadd.s32 1, %s745_s14 }
   0x9   : > { %p47_p0 = scmp.eq.s32.totalorder %s46_s18, 0  ;;  %p56_p1 = scmp.ne.s32.totalorder %s745_s14, %s741_s13 }
   0xa   : > { %p62_p2 = scmp.ne.s32.totalorder %s741_s13, %s737_s12  ;;  %p960_p3 = scmp.eq.s32.totalorder %s797_s16, 0 }
   0xb   : > { %s810_s20 = scalar_select %p47_p0, %s745_s14, %s49_s19  }
   0xc   : > { %p814_p4 = por %p960_p3, %p62_p2  ;;  %p508_p5 = scmp.ge.s32.totalorder %s749_s15, 1 }
   0xd   : > { %p120_p6 = scmp.lt.s32.totalorder %s749_s15, 4  ;;  %p57_p9 = scmp.eq.s32.totalorder %s749_s15, 0 }
   0xe   : > { %s963_s21 = scalar_select %p814_p4, 1, 0 }
   0xf   : > { %p821_p8 = pnand %p508_p5, %p120_p6  ;;  %p559_p10 = scmp.lt.s32.totalorder %s749_s15, 3 }
  0x10   : > { %s828_s23 = sand.u32 1, %s745_s14   ;;  %p58_p12 = por %p57_p9, %p56_p1 }
  0x11   : > { %s964_s22 = scalar_select %p821_p8, 1, 0 }
  0x12   : > { %p547_p11 = pneg %p821_p8  ;;  %s511_s24 = sshll.u32 %s828_s23, 3 }
  0x13   : > { %s512_s25 = sshll.u32 %s749_s15, 7  ;;  %s146_s26 = scalar_lea.vmem [#allocation6], %s511_s24 }
  0x14   : > { %p548_p13 = pnand %p547_p11, %p960_p3  ;;  %s153_s27 = sshll.u32 %s146_s26, 4  ;;  %s849_s27 = int_to_ptr.vmem [resolvable:$true] %s153_s27 }
  0x15   : > { %s844_s30 = scalar_lea.hbm %s957_s1, %s512_s25  ;;  %s751_s4 = smov [#allocation2]  }
  0x16   : > { %550 = dma.hbm_to_smem (!%p548_p13), %s956_s0, 16, %s751_s4, [#allocation5]  }
  0x17   : > { %p853_p0 = pnand %p559_p10, %p58_p12  ;;  %s860_s10 = scalar_lea.hbm %s958_s2, %s512_s25 }
  0x18   : > { %s143_s11 = scalar_lea.sflag [#allocation3], %s828_s23  ;;  %s623_s12 = scalar_lea.hbm %s844_s30, 128 }
  0x19   : > { %p624_p1 = scmp.ne.s32.totalorder %s844_s30, %s623_s12  ;;  %p625_p2 = pneg %p853_p0 }
  0x1a   : > { %s628_s19 = scalar_lea.hbm %s957_s1, 384  ;;  %p629_p9 = scmp.lt.s32.totalorder %s844_s30, %s957_s1 }
  0x1b   : > { %p626_p5 = pnand %p625_p2, %p624_p1  ;;  %p630_p10 = scmp.lt.s32.totalorder %s628_s19, %s623_s12 }
  0x1d   : > { %p627_p6 = pneg %p626_p5  ;;  %p631_p11 = por %p630_p10, %p629_p9 }
  0x1f   : > { %p632_p12 = pnand %p631_p11, %p627_p6 }
  0x21   : > { %635 = shalt.err (!%p632_p12)
}
  0x22   : > { %s636_s25 = scalar_lea.vmem %s849_s27, 128  ;;  %s752_s29 = smov [#allocation6]  }
  0x23   : > { %p637_p13 = scmp.ne.s32.totalorder %s849_s27, %s636_s25  ;;  %s641_s4 = sshll.u32 %s752_s29, 4  ;;  %s642_s4 = int_to_ptr.vmem [resolvable:$false] %s641_s4 }
  0x24   : > { %s643_s5 = scalar_lea.vmem %s642_s4, 256  ;;  %p644_p7 = scmp.lt.s32.totalorder %s849_s27, %s642_s4 }
  0x25   : > { %p639_p1 = pnand %p637_p13, %p625_p2  ;;  %p645_p3 = scmp.lt.s32.totalorder %s643_s5, %s636_s25 }
  0x27   : > { %p640_p5 = pneg %p639_p1  ;;  %p646_p4 = por %p645_p3, %p644_p7 }
  0x29   : > { %p647_p9 = pnand %p646_p4, %p640_p5 }
  0x2b   : > { %650 = shalt.err (!%p647_p9)
}
  0x2c   : > { %554 = dma.hbm_to_vmem [thread:$0]  (!%p853_p0), %s844_s30, 128, %s849_s27, %s143_s11  }
  0x2d   : > { %s164_s6 = scalar_lea.vmem [#allocation7], %s511_s24  ;;  %s161_s9 = scalar_lea.sflag [#allocation8], %s828_s23 }
  0x2e   : > { %s171_s8 = sshll.u32 %s164_s6, 4  ;;  %s651_s12 = scalar_lea.hbm %s860_s10, 128  ;;  %s172_s8 = int_to_ptr.vmem [resolvable:$true] %s171_s8 }
  0x2f   : > { %p652_p3 = scmp.ne.s32.totalorder %s860_s10, %s651_s12  ;;  %s656_s19 = scalar_lea.hbm %s958_s2, 384 }
  0x30   : > { %p657_p6 = scmp.lt.s32.totalorder %s860_s10, %s958_s2  ;;  %p658_p10 = scmp.lt.s32.totalorder %s656_s19, %s651_s12 }
  0x31   : > { %p654_p4 = pnand %p652_p3, %p625_p2 }
  0x32   : > { %p659_p11 = por %p658_p10, %p657_p6 }
  0x33   : > { %p655_p7 = pneg %p654_p4 }
  0x35   : > { %p660_p12 = pnand %p659_p11, %p655_p7 }
  0x37   : > { %663 = shalt.err (!%p660_p12)
}
  0x38   : > { %s664_s24 = scalar_lea.vmem %s172_s8, 128  ;;  %s753_s23 = smov [#allocation7]  }
  0x39   : > { %p665_p13 = scmp.ne.s32.totalorder %s172_s8, %s664_s24  ;;  %s669_s27 = sshll.u32 %s753_s23, 4  ;;  %s670_s27 = int_to_ptr.vmem [resolvable:$false] %s669_s27 }
  0x3a   : > { %s671_s30 = scalar_lea.vmem %s670_s27, 256  ;;  %p672_p9 = scmp.lt.s32.totalorder %s172_s8, %s670_s27 }
  0x3b   : > { %p667_p1 = pnand %p665_p13, %p625_p2  ;;  %p673_p3 = scmp.lt.s32.totalorder %s671_s30, %s664_s24 }
  0x3d   : > { %p668_p5 = pneg %p667_p1  ;;  %p674_p4 = por %p673_p3, %p672_p9 }
  0x3f   : > { %p675_p8 = pnand %p674_p4, %p668_p5 }
  0x41   : > { %678 = shalt.err (!%p675_p8)
}
  0x42   : > { %557 = dma.hbm_to_vmem [thread:$0]  (!%p853_p0), %s860_s10, 128, %s172_s8, %s161_s9  }
  0x43   : > { %p966_p7 = scmp.ne.s32.totalorder %s964_s22, 0 }
  0x44   : > { %p967_p6 = scmp.eq.s32.totalorder (!%p966_p7), %s797_s16, 0 }
  0x45   : > { %180 = sbr.rel (%p966_p7) target bundleno = 930 (0x3a2), region = 32 }
  0x4a   : > { %720 = dma.done.wait (%p967_p6), [#allocation5], 16   ;;  %p968_p2 = pmov %p967_p6 }
  0x4b   : > { %s186_s11 = sand.u32 1, %s741_s13   ;;  %p969_p8 = scmp.ne.s32.totalorder %s963_s21, 0 }
  0x4c   : > { %722 = vsyncadd (%p968_p2), [#allocation5], 4294967280  ;;  %s517_s25 = sshll.u32 %s186_s11, 3  ;;  %s187_s29 = scalar_lea.sflag [#allocation3], %s186_s11 }
  0x4d   : > { %s190_s4 = scalar_lea.vmem [#allocation6], %s517_s25 }
  0x4e   : > { %724 = dma.done.wait (%p969_p8), %s187_s29, 128  }
  0x4f   : > { %726 = vsyncadd (%p969_p8), %s187_s29, 4294967168  ;;  %s196_s22 = scalar_lea.sflag [#allocation8], %s186_s11  ;;  %s199_s7 = scalar_lea.vmem [#allocation7], %s517_s25 }
  0x50   : > { %728 = dma.done.wait (%p969_p8), %s196_s22, 128  }
  0x51   : > { %730 = vsyncadd (%p969_p8), %s196_s22, 4294967168 }
  0x52   : > { %204 = sfence }
  0x53   : > { %p970_p0 = scmp.ne.s32.totalorder %s797_s16, 0 }
  0x55   : > { %226 = sbr.rel (%p970_p0) target bundleno = 92 (0x5c), region = 48 }
  0x5a   : > { %vm227_vm0 = vcmask 0   ;;  %v754_v0 = vmov 0.0  }
  0x5b   : > { %228 = vst.msk [vmem:[#allocation9] sm:$0x1] %vm227_vm0, %v754_v0 }
  0x5c PF: > { %v230_v1 = vld [vmem:[%s199_s7] sm:$0xff]  ;;  %vm232_vm1 = vcmask 261120   ;;  %v229_v2 = vld [vmem:[%s190_s4] sm:$0xff]  ;;  %v755_v5 = vmov 0.0   ;;  %vm756_vm2 = vmmov 0   ;;  %v362_v17 = vlaneseq  ;;  %s408_s21 = sld [smem:[#allocation2 + %s797_s16]] }
  0x5d   : > { %v243_v3 = vmul.f32 %v230_v1, %v230_v1  ;;  %v231_v4 = vmul.f32 %v229_v2, %v229_v2  ;;  %528 = vmatprep.subr.mxu0 %v755_v5  ;;  %530 = vmatprep.mubr.msk.f32.mxu0 %vm756_vm2, %v755_v5  ;;  %vm371_vm7 = vcmask 64512   ;;  %v384_v36 = vmul.f32 %v230_v1, %v229_v2  ;;  %s757_s8 = smov [#allocation9]   ;;  %p561_p10 = scmp.eq.s32.totalorder %s797_s16, 2 }
  0x5e   : > { %529 = vmatpush3.xpose.msk.msra.mxu0 %vm232_vm1, %v230_v1  ;;  %v363_v19 = vshrl.u32 %v362_v17, 7  ;;  %vm394_vm8 = vcmask 7168   ;;  %s422_s9 = sshll.u32 %s757_s8, 4  ;;  %vm413_vm9 = vcmask 0   ;;  %s423_s9 = int_to_ptr.vmem [resolvable:$true] %s422_s9 }
  0x5f   : > { %v244_v6 = vsel %vm232_vm1, %v243_v3, 0.0  ;;  %v233_v7 = vsel %vm232_vm1, %v231_v4, 0.0  ;;  %v385_v39 = vsel %vm232_vm1, %v384_v36, 0.0  ;;  %s679_s12 = scalar_lea.vmem %s423_s9, 16  ;;  %s685_s15 = scalar_lea.vmem %s423_s9, 32 }
  0x60   : > { %245 = vadd.xlane.f32.xlu0 %v244_v6  ;;  %v364_v21 = vsub.s32 0, %v363_v19  ;;  %p680_p11 = scmp.ne.s32.totalorder %s423_s9, %s679_s12  ;;  %p686_p1 = scmp.lt.s32.totalorder %s423_s9, %s423_s9 }
  0x61   : > { %531 = vmatmul.mubr.msk.f32.vlgmr.msra.gmra.mxu0 %vm232_vm1, %v229_v2  ;;  %p687_p5 = scmp.lt.s32.totalorder %s685_s15, %s679_s12 }
  0x62   : > { %v409_v59 = vld [vmem:[#allocation9] sm:$0x1]  ;;  %p681_p12 = pnand %p680_p11, %p561_p10 }
  0x63   : > { %p688_p9 = por %p687_p5, %p686_p1 }
  0x64   : > { %234 = vadd.xlane.f32.xlu0 %v233_v7  ;;  %p682_p13 = pneg %p681_p12 }
  0x66   : > { %p689_p3 = pnand %p688_p9, %p682_p13 }
  0xe9   : > { %v246_v8 = vpop.xlane.xlu0 %245 }
  0xea   : > { %600 = vrsqrt.f32 %v246_v8  ;;  %vm249_vm3 = vcmp.eq.f32.partialorder %v246_v8, inf  ;;  %v252_v11 = vand.u32 2147483648, %v246_v8  ;;  %vm251_vm4 = vcmp.eq.f32.partialorder %v246_v8, 0.0 }
  0xed   : > { %v235_v16 = vpop.xlane.xlu0 %234 }
  0xee   : > { %602 = vrsqrt.f32 %v235_v16  ;;  %vm238_vm5 = vcmp.eq.f32.partialorder %v235_v16, inf  ;;  %v241_v22 = vand.u32 2147483648, %v235_v16  ;;  %vm240_vm6 = vcmp.eq.f32.partialorder %v235_v16, 0.0 }
  0xf7   : > { %v601_v9 = vpop.eup %600 }
  0xf8   : > { %v248_v10 = vmul.f32 %v601_v9, %v246_v8 }
  0xfa   : > { %v250_v12 = vsel %vm249_vm3, %v246_v8, %v248_v10 }
  0xfb   : > { %v253_v13 = vsel %vm251_vm4, %v252_v11, %v250_v12  ;;  %v603_v18 = vpop.eup %602 }
  0xfc   : > { %330 = vxpose.xlu1.b32.start.end [1/1] (short) (narrow) %v253_v13, 8  ;;  %v237_v20 = vmul.f32 %v603_v18, %v235_v16 }
  0xfe   : > { %v239_v23 = vsel %vm238_vm5, %v235_v16, %v237_v20 }
  0xff   : > { %v242_v26 = vsel %vm240_vm6, %v241_v22, %v239_v23 }
 0x100   : > { %v388_v40 = vmul.f32 %v253_v13, %v242_v26 }
 0x102   : > { %v389_v41 = vmax.f32 %v388_v40, 1e-08 }
 0x121   : > { %v326_v14 = vpop.f32.mrf.mxu0 }
 0x123   : > { %v532_v15 = vpop.f32.mrf.mxu0 }
 0x178   : > { %v346_v24 = vpop.trf.xlu1 }
 0x179   : > { %v365_v25 = vrot.slane %v346_v24, %v364_v21 }
 0x17b   : > { %v366_v27 = vmul.f32 %v365_v25, %v242_v26 }
 0x17d   : > { %v367_v28 = vmax.f32 %v366_v27, 1e-08 }
 0x17f   : > { %604 = vrcp.f32 %v367_v28 }
 0x18c   : > { %v605_v29 = vpop.eup %604 }
 0x18d   : > { %v369_v30 = vmul.f32 %v605_v29, %v326_v14 }
 0x18f   : > { %v370_v31 = vmul.f32 14.285714, %v369_v30 }
 0x191   : > { %v372_v32 = vsel %vm371_vm7, %v370_v31, -inf }
 0x192   : > { %373 = vmax.xlane.f32.xlu1 %v372_v32 }
 0x21b   : > { %v374_v33 = vpop.xlane.xlu1 %373 }
 0x21c   : > { %v375_v34 = vsub.f32 %v370_v31, %v374_v33 }
 0x21e   : > { %v376_v35 = vmul.f32 1.442695, %v375_v34 }
 0x220   : > { %606 = vpow2.f32 %v376_v35 }
 0x221   : > { %608 = vrcp.f32 %v389_v41 }
 0x22d   : > { %v607_v37 = vpop.eup %606 }
 0x22e   : > { %v378_v38 = vsel %vm371_vm7, %v607_v37, 0.0  ;;  %v609_v44 = vpop.eup %608 }
 0x22f   : > { %379 = vadd.xlane.f32.xlu0 %v378_v38 }
 0x233   : > { %386 = vadd.xlane.f32.xlu0 %v385_v39 }
 0x2b8   : > { %v380_v42 = vpop.xlane.xlu0 %379 }
 0x2b9   : > { %610 = vlog2.f32 %v380_v42 }
 0x2bc   : > { %v387_v43 = vpop.xlane.xlu0 %386 }
 0x2bd   : > { %v391_v45 = vmul.f32 %v609_v44, %v387_v43 }
 0x2bf   : > { %v392_v48 = vmul.f32 14.285714, %v391_v45 }
 0x2c6   : > { %v611_v46 = vpop.eup %610 }
 0x2c7   : > { %v382_v47 = vmul.f32 0.6931472, %v611_v46 }
 0x2c9   : > { %v383_v49 = vadd.f32 %v382_v47, %v374_v33 }
 0x2cb   : > { %v393_v50 = vsub.f32 %v383_v49, %v392_v48 }
 0x2cd   : > { %v395_v51 = vsel %vm394_vm8, %v393_v50, 0.0 }
 0x2ce   : > { %396 = vadd.xlane.f32.xlu0 %v395_v51 }
 0x357   : > { %v397_v52 = vpop.xlane.xlu0 %396 }
 0x358   : > { %v398_v53 = vrot.slane %v397_v52, 4 }
 0x35a   : > { %v399_v54 = vadd.f32 %v398_v53, %v397_v52 }
 0x35c   : > { %v400_v55 = vrot.slane %v399_v54, 2 }
 0x35e   : > { %v401_v56 = vadd.f32 %v400_v55, %v399_v54 }
 0x360   : > { %v402_v57 = vrot.slane %v401_v56, 1 }
 0x362   : > { %v403_v58 = vadd.f32 %v402_v57, %v401_v56 }
 0x364   : > { %533 = vpush %v403_v58 }
 0x395   : > { %s534_s10 = spop %533 }
 0x396   : > { %s407_s5 = smul.f32 0.125, %s534_s10 }
 0x398   : > { %s410_s6 = smul.f32 %s408_s21, %s407_s5 }
 0x39a   : > { %v411_v60 = vstv %s410_s6 }
 0x39b   : > { %v412_v61 = vadd.f32 %v411_v60, %v409_v59 }
 0x39d   : > { %414 = vst.msk [vmem:[#allocation9] sm:$0x1] %vm413_vm9, %v412_v61 }
 0x39e   : > { %692 = shalt.err (!%p689_p3)
}
 0x39f   : > { %544 = dma.vmem_to_hbm [thread:$0]  (%p561_p10), %s423_s9, 16, %s959_s3, [#allocation4]  }
 0x3a0   : > { %732 = dma.done.wait (%p561_p10), [#allocation4], 16  }
 0x3a1   : > { %734 = vsyncadd (%p561_p10), [#allocation4], 4294967280 }
 0x3a2 PF: > { %p18_p4 = scmp.ge.s32.totalorder %s800_s17, 5   ;;  %s971_s12 = smov %s741_s13 }
 0x3a3   : > { %s972_s13 = smov %s745_s14  ;;  %s973_s14 = smov %s810_s20 }
 0x3a4   : > { %s974_s15 = smov %s800_s17  ;;  %20 = sbr.rel (!%p18_p4) target bundleno = 7 (0x7), region = 91 }
 0x3a9   :  { %435 = vsyncpa [#allocation3], 1 }
 0x3aa   :  { %437 = vsyncpa [#allocation3 + $0x1], 1 }
 0x3ab   :  { %438 = vsyncpa [#allocation8], 1 }
 0x3ac   :  { %440 = vsyncpa [#allocation8 + $0x1], 1 }
 0x3ad   :  { %441 = vsyncpa [#allocation4], 1 }
 0x3ae   :  { %443 = vsyncpa [#allocation4 + $0x1], 1 }
 0x3af   :  { %444 = vsyncpa [#allocation5], 1 }
 0x3b0   :  { %446 = vsyncpa [#allocation5 + $0x1], 1 }

</bundles_post_ra>
